<compile_context>
chip_gen: v5e
topology: v5e:2x2
jax: 0.10.0
libtpu: 0.0.40
codegen_flags: <defaults>
</compile_context>

<pallas_src>
import jax
import jax.numpy as jnp
from jax.experimental import pallas as pl
from jax.experimental.pallas import tpu as pltpu


def outconv_kernel(x_ref, w_ref, b_ref, o_ref):
    # x_ref: (bn, Cin, thw)   w_ref: (Cout, Cin)   b_ref: (Cout, 1)
    # o_ref: (bn, Cout, thw)  -- lane-dense last dim
    w = w_ref[...]
    b = b_ref[...]
    # bn is a small static constant -> unrolled; avoids in-kernel transposes.
    for i in range(x_ref.shape[0]):
        acc = jnp.dot(w, x_ref[i], preferred_element_type=jnp.float32)
        o_ref[i] = (acc + b).astype(o_ref.dtype)  # bias add + cast in f32


def _const_block_spec(shape):
    """Block-invariant operand: single-buffered (no redundant double buffer)."""
    index_map = lambda n, j: (0,) * len(shape)
    try:
        return pl.BlockSpec(shape, index_map, pipeline_mode=pl.Buffered(1))
    except TypeError:  # older jax without pipeline_mode kwarg
        return pl.BlockSpec(shape, index_map)


def outconv_pallas(x_nchw, weight, bias, *, vmem_budget_bytes=12 * 1024 * 1024):
    """1x1 conv in NCHW. x: (N, Cin, H, W); weight: (Cout, Cin, 1, 1); bias: (Cout,)."""
    N, Cin, H, W = x_nchw.shape
    Cout = weight.shape[0]
    HW = H * W

    # Free reshapes only (no transposes): channel mixing stays in NCHW layout.
    x = x_nchw.reshape(N, Cin, HW)
    w_mat = weight.reshape(Cout, Cin)   # (Cout, Cin)
    b_mat = bias.reshape(Cout, 1)       # (Cout, 1)

    xb = jnp.dtype(x.dtype).itemsize
    ob = xb  # output keeps the input dtype

    # Bytes moved through VMEM per HW column (x block + out block, double-buffered).
    col_bytes = 2 * (Cin * xb + Cout * ob)
    col_budget = max(128, vmem_budget_bytes // col_bytes)

    if HW <= col_budget:
        # Full-HW block (exempt from the 128-multiple rule); pack several images
        # per step so each grid step still moves a large slab.
        thw = HW
        bn = max(1, min(N, col_budget // max(HW, 1)))
    else:
        # Lane-dense 128-multiple tile as large as the VMEM budget allows.
        thw = max(128, (col_budget // 128) * 128)
        bn = 1

    n_b = pl.cdiv(N, bn)
    n_hw = pl.cdiv(HW, thw)

    flops = 2 * N * HW * Cin * Cout + N * HW * Cout
    bytes_accessed = (N * HW * (Cin * xb + Cout * ob)
                      + Cout * Cin * jnp.dtype(w_mat.dtype).itemsize
                      + Cout * jnp.dtype(b_mat.dtype).itemsize)

    out = pl.pallas_call(
        outconv_kernel,
        out_shape=jax.ShapeDtypeStruct((N, Cout, HW), x_nchw.dtype),
        grid_spec=pltpu.PrefetchScalarGridSpec(
            num_scalar_prefetch=0,
            grid=(n_b, n_hw),
            in_specs=[
                pl.BlockSpec((bn, Cin, thw), lambda n, j: (n, 0, j)),
                _const_block_spec((Cout, Cin)),
                _const_block_spec((Cout, 1)),
            ],
            out_specs=pl.BlockSpec((bn, Cout, thw), lambda n, j: (n, 0, j)),
        ),
        compiler_params=pltpu.CompilerParams(
            dimension_semantics=("parallel", "parallel")),
        cost_estimate=pl.CostEstimate(
            flops=flops, transcendentals=0, bytes_accessed=bytes_accessed),
    )(x, w_mat, b_mat)

    return out.reshape(N, Cout, H, W)


if __name__ == "__main__":
    in_channels, out_channels = 4, 8
    N, H, W = 2, 16, 16

    key = jax.random.PRNGKey(0)
    kx, kw, kb = jax.random.split(key, 3)

    x = jax.random.normal(kx, (N, in_channels, H, W), dtype=jnp.float32)
    # Deterministic synthetic params matching nn.Conv2d(in, out, kernel_size=1).
    weight = jax.random.normal(kw, (out_channels, in_channels, 1, 1), dtype=jnp.float32) * 0.1
    bias = jax.random.normal(kb, (out_channels,), dtype=jnp.float32) * 0.1

    y = jax.block_until_ready(outconv_pallas(x, weight, bias))

    # Reference check (plain JAX einsum for a 1x1 conv).
    y_ref = jnp.einsum("nchw,oc->nohw", x, weight.reshape(out_channels, in_channels)) \
        + bias.reshape(1, out_channels, 1, 1)
    assert y.shape == (N, out_channels, H, W)
    assert jnp.allclose(y, y_ref, atol=1e-5, rtol=1e-5)

    print("KERNEL_OK")
</pallas_src>

<mosaic_0001>
module attributes {stable_mosaic.version = 11 : i64} {
  func.func @outconv_kernel(%arg0: i32, %arg1: i32, %arg2: memref<2x4x256xf32, #tpu.memory_space<vmem>>, %arg3: memref<8x4xf32, #tpu.memory_space<vmem>>, %arg4: memref<8x1xf32, #tpu.memory_space<vmem>>, %arg5: memref<2x8x256xf32, #tpu.memory_space<vmem>>) attributes {dimension_semantics = [#tpu.dimension_semantics<parallel>, #tpu.dimension_semantics<parallel>], iteration_bounds = array<i64: 1, 1>, scalar_prefetch = 0 : i64, scratch_operands = 0 : i64, tpu.core_type = #tpu.core_type<tc>, window_params = [{transform_indices = @transform_0, window_bounds = array<i64: 2, 4, 256>}, {pipeline_mode = #tpu.pipeline_mode<synchronous>, transform_indices = @transform_1, window_bounds = array<i64: 8, 4>}, {pipeline_mode = #tpu.pipeline_mode<synchronous>, transform_indices = @transform_2, window_bounds = array<i64: 8, 1>}, {transform_indices = @transform_3, window_bounds = array<i64: 2, 8, 256>}]} {
    %c0 = arith.constant 0 : index
    %c0_0 = arith.constant 0 : index
    %0 = vector.load %arg3[%c0, %c0_0] : memref<8x4xf32, #tpu.memory_space<vmem>>, vector<8x4xf32>
    %c0_1 = arith.constant 0 : index
    %c0_2 = arith.constant 0 : index
    %1 = vector.load %arg4[%c0_1, %c0_2] : memref<8x1xf32, #tpu.memory_space<vmem>>, vector<8x1xf32>
    %c0_3 = arith.constant 0 : index
    %c0_4 = arith.constant 0 : index
    %c0_5 = arith.constant 0 : index
    %2 = vector.load %arg2[%c0_3, %c0_4, %c0_5] : memref<2x4x256xf32, #tpu.memory_space<vmem>>, vector<1x4x256xf32>
    %3 = vector.shape_cast %2 : vector<1x4x256xf32> to vector<4x256xf32>
    %cst = arith.constant dense<0.000000e+00> : vector<8x256xf32>
    %4 = tpu.matmul %0, %3, %cst {dimension_numbers = #tpu.dot_dimension_numbers<[1], [0], [0], [1], [0, 0, 1, 1], [], []>} : vector<8x4xf32>, vector<4x256xf32>, vector<8x256xf32> -> vector<8x256xf32>
    %5 = vector.broadcast %1 : vector<8x1xf32> to vector<8x256xf32>
    %6 = arith.addf %4, %5 : vector<8x256xf32>
    %c0_6 = arith.constant 0 : index
    %c0_7 = arith.constant 0 : index
    %c0_8 = arith.constant 0 : index
    %7 = vector.load %arg5[%c0_6, %c0_7, %c0_8] : memref<2x8x256xf32, #tpu.memory_space<vmem>>, vector<1x8x256xf32>
    %8 = vector.shape_cast %7 : vector<1x8x256xf32> to vector<8x256xf32>
    %9 = vector.shape_cast %6 : vector<8x256xf32> to vector<1x8x256xf32>
    tpu.vector_store %arg5[%c0_6, %c0_7, %c0_8], %9 {strides = array<i32>} : memref<2x8x256xf32, #tpu.memory_space<vmem>>, vector<1x8x256xf32>,
    %c1 = arith.constant 1 : index
    %c0_9 = arith.constant 0 : index
    %c0_10 = arith.constant 0 : index
    %10 = vector.load %arg2[%c1, %c0_9, %c0_10] : memref<2x4x256xf32, #tpu.memory_space<vmem>>, vector<1x4x256xf32>
    %11 = vector.shape_cast %10 : vector<1x4x256xf32> to vector<4x256xf32>
    %cst_11 = arith.constant dense<0.000000e+00> : vector<8x256xf32>
    %12 = tpu.matmul %0, %11, %cst_11 {dimension_numbers = #tpu.dot_dimension_numbers<[1], [0], [0], [1], [0, 0, 1, 1], [], []>} : vector<8x4xf32>, vector<4x256xf32>, vector<8x256xf32> -> vector<8x256xf32>
    %13 = vector.broadcast %1 : vector<8x1xf32> to vector<8x256xf32>
    %14 = arith.addf %12, %13 : vector<8x256xf32>
    %c1_12 = arith.constant 1 : index
    %c0_13 = arith.constant 0 : index
    %c0_14 = arith.constant 0 : index
    %15 = vector.load %arg5[%c1_12, %c0_13, %c0_14] : memref<2x8x256xf32, #tpu.memory_space<vmem>>, vector<1x8x256xf32>
    %16 = vector.shape_cast %15 : vector<1x8x256xf32> to vector<8x256xf32>
    %17 = vector.shape_cast %14 : vector<8x256xf32> to vector<1x8x256xf32>
    tpu.vector_store %arg5[%c1_12, %c0_13, %c0_14], %17 {strides = array<i32>} : memref<2x8x256xf32, #tpu.memory_space<vmem>>, vector<1x8x256xf32>,
    return
  }
  func.func @transform_0(%arg0: i32, %arg1: i32) -> (i32, i32, i32) {
    %c0_i32 = arith.constant 0 : i32
    %c0_i32_0 = arith.constant 0 : i32
    return %arg0, %c0_i32, %arg1 : i32, i32, i32
  }
  func.func @transform_1(%arg0: i32, %arg1: i32) -> (i32, i32) {
    %c0_i32 = arith.constant 0 : i32
    %c0_i32_0 = arith.constant 0 : i32
    %c0_i32_1 = arith.constant 0 : i32
    return %c0_i32, %c0_i32_0 : i32, i32
  }
  func.func @transform_2(%arg0: i32, %arg1: i32) -> (i32, i32) {
    %c0_i32 = arith.constant 0 : i32
    %c0_i32_0 = arith.constant 0 : i32
    %c0_i32_1 = arith.constant 0 : i32
    return %c0_i32, %c0_i32_0 : i32, i32
  }
  func.func @transform_3(%arg0: i32, %arg1: i32) -> (i32, i32, i32) {
    %c0_i32 = arith.constant 0 : i32
    %c0_i32_0 = arith.constant 0 : i32
    return %arg0, %c0_i32, %arg1 : i32, i32, i32
  }
}

</mosaic_0001>

<bundles_post_ra>
// kernel: tpu_custom_call.1
= control target key start
LH: loop header
LB: loop body
LE: loop exit
PB: predicated region body
PF: predicated region fallthrough
CT: control target
= control target key end

     0   :  { %v189_v1 = vmov 0   ;;  %s228_s0 = inlined_call_operand.vmem [shape: f32[2,4,256], index: 0, kind: input, shape index: {}]   ;;  %s229_s1 = inlined_call_operand.vmem [shape: f32[8,4], index: 1, kind: input, shape index: {}]   ;;  %s230_s2 = inlined_call_operand.vmem [shape: f32[8,1], index: 2, kind: input, shape index: {}]   ;;  %s231_s3 = inlined_call_operand.hbm [shape: f32[2,8,256], index: 3, kind: output, shape index: {}]  }
   0x1   :  { %v17_v0 = vld [vmem:[%s228_s0] sm:$0xff]  ;;  %162 = vset.pattern.permute.xlu0 %v189_v1 }
   0x2   :  { %24 = vst [vmem:[#allocation1] ss:$2 sm:$0xff] %v17_v0  ;;  %v16_v2 = vld [vmem:[%s230_s2] sm:$0xff] }
   0x3   :  { %8 = vsyncpa [#allocation3], 0  ;;  %20 = vperm.xlu0 %162, %v16_v2   ;;  %v153_v3 = vld [vmem:[%s228_s0 + $0x8] sm:$0xff]  ;;  %vm31_vm0 = vcmask 1043456   ;;  %v15_v6 = vld [vmem:[%s229_s1] sm:$0xff]  ;;  %vm27_vm1 = vcmask 31744  }
   0x4   :  { %s190_s0 = smov [#allocation2]   ;;  %s137_s21 = sshll.u32 %s231_s3, 4  ;;  %s138_s21 = int_to_ptr.hbm [resolvable:$true] %s137_s21 }
   0x5   :  { %s135_s1 = sshll.u32 %s190_s0, 4  ;;  %s191_s22 = smov 256   ;;  %s136_s1 = int_to_ptr.vmem [resolvable:$true] %s135_s1 }
   0x6   :  { %s192_s23 = smov 16  }
   0x9   :  { %v25_v4 = vld.sshfl [vmem:[#allocation1] sm:$0xff pattern:$0x75316420]  ;;  %v26_v5 = vld.sshfl [vmem:[#allocation1 + $0x8] sm:$0xff pattern:$0x75316420] }
   0xa   :  { %81 = vst [vmem:[#allocation1] ss:$2 sm:$0xff] %v153_v3  ;;  %149 = vmatpush.msk.msra.mxu0 %vm31_vm0, %v25_v4  ;;  %151 = vmatpush.msk.msra.mxu1 %vm31_vm0, %v26_v5 }
   0xb   :  { %150 = vmatmul.msk.f32.vlgmr.msra.gmra.mxu0 %vm27_vm1, %v15_v6  ;;  %152 = vmatmul.msk.f32.vlgmr.msra.gmra.mxu1 %vm27_vm1, %v15_v6 }
  0x11   :  { %v82_v7 = vld.sshfl [vmem:[#allocation1] sm:$0xff pattern:$0x75316420]  ;;  %v83_v8 = vld.sshfl [vmem:[#allocation1 + $0x8] sm:$0xff pattern:$0x75316420] }
  0x12   :  { %154 = vmatpush.msk.msra.mxu2 %vm31_vm0, %v82_v7  ;;  %156 = vmatpush.msk.msra.mxu3 %vm31_vm0, %v83_v8 }
  0x13   :  { %155 = vmatmul.msk.f32.vlgmr.msra.gmra.mxu2 %vm27_vm1, %v15_v6  ;;  %157 = vmatmul.msk.f32.vlgmr.msra.gmra.mxu3 %vm27_vm1, %v15_v6 }
  0x75   :  { %v21_v9 = vpop.permute.xlu0 %20 }
  0x88   :  { %v53_v10 = vpop.f32.mrf.mxu0  ;;  %v73_v11 = vpop.f32.mrf.mxu1 }
  0x89   :  { %v54_v12 = vadd.f32 %v53_v10, %v21_v9  ;;  %v74_v13 = vadd.f32 %v73_v11, %v21_v9 }
  0x8b   :  { %76 = vst [vmem:[#allocation2] sm:$0xff] %v54_v12 }
  0x8c   :  { %77 = vst [vmem:[#allocation2 + $0x8] sm:$0xff] %v74_v13 }
  0x96   :  { %v105_v14 = vpop.f32.mrf.mxu2  ;;  %v125_v15 = vpop.f32.mrf.mxu3 }
  0x97   :  { %v106_v16 = vadd.f32 %v105_v14, %v21_v9  ;;  %v126_v17 = vadd.f32 %v125_v15, %v21_v9 }
  0x99   :  { %129 = vst [vmem:[#allocation2 + $0x10] sm:$0xff] %v106_v16 }
  0x9a   :  { %130 = vst [vmem:[#allocation2 + $0x18] sm:$0xff] %v126_v17 }
  0x9b   :  { %143 = dma.vmem_to_hbm [thread:$0]  %s136_s1, 512, %s138_s21, [#allocation3], %s191_s22, %s191_s22, %s192_s23  }
  0x9c   :  { %187 = dma.done.wait [#allocation3], 512  }
  0x9d   :  { %188 = vsyncadd [#allocation3], 4294966784 }
  0x9e   :  { %148 = vsyncpa [#allocation3], 1 }

</bundles_post_ra>
